<compile_context>
chip_gen: v6e
topology: v6e:2x2x1
jax: 0.10.0
libtpu: 0.0.40
codegen_flags: <defaults>
</compile_context>

<pallas_src>
import functools

import jax
import jax.numpy as jnp
from jax import lax
from jax.experimental import pallas as pl
from jax.experimental.pallas import tpu as pltpu

TOP_K = 5
_LANE = 128
_VMEM_LIMIT = 32 * 1024 * 1024  # fits the default scoped budget on all chips


def _round_up(n: int, m: int) -> int:
    return ((n + m - 1) // m) * m


def _pick_tile_b(B: int) -> int:
    """Largest batch tile (multiple of 8, <=128) dividing B; else full B."""
    if B % 8 != 0:
        return B
    for cand in (128, 64, 32, 16, 8):
        if B % cand == 0:
            return cand
    return B


@functools.lru_cache(maxsize=8)
def _fused_dft_matrices(T: int):
    """bf16 fused rfft / irfft bases, frequency axis padded to mult. of 128.

    Returns:
      w_fwd: [T, 2*Fp]   x @ w_fwd = [Re | Im] of rfft(x)  (padded bins -> 0)
      w_inv: [2*Fp, T]   [Re | Im] @ w_inv = irfft(xf)
    (Cached across calls; do not call under jit tracing.)
    """
    F = T // 2 + 1
    Fp = _round_up(F, _LANE)
    t = jnp.arange(T, dtype=jnp.float32)[:, None]                  # [T, 1]
    k = jnp.arange(Fp, dtype=jnp.float32)[None, :]                 # [1, Fp]
    ang = 2.0 * jnp.pi * t * k / T                                 # [T, Fp]
    valid = (jnp.arange(Fp) < F)[None, :]                          # [1, Fp]
    cos = jnp.cos(ang)
    sin = jnp.sin(ang)
    C = jnp.where(valid, cos, 0.0)                                 # [T, Fp]
    S = jnp.where(valid, -sin, 0.0)                                # [T, Fp]
    w_fwd = jnp.concatenate([C, S], axis=1).astype(jnp.bfloat16)   # [T, 2Fp]
    # irfft weights (even T): w_0 = w_{T/2} = 1/T, else 2/T; padded bins 0.
    w = jnp.full((Fp,), 2.0 / T, dtype=jnp.float32)
    w = w.at[0].set(1.0 / T).at[F - 1].set(1.0 / T)
    w = jnp.where(jnp.arange(Fp) < F, w, 0.0)[:, None]             # [Fp, 1]
    ICr = w * cos.T                                                # [Fp, T]
    ICi = -w * sin.T                                               # [Fp, T]
    w_inv = jnp.concatenate([ICr, ICi], axis=0).astype(jnp.bfloat16)  # [2Fp,T]
    return w_fwd, w_inv


def _masked_mag2(re, im, tile_idx):
    """|xf|^2 with the PyTorch `freq[0] = 0` quirk (global batch row 0)."""
    mag2 = re * re + im * im
    row = lax.broadcasted_iota(jnp.int32, mag2.shape, 0)
    return jnp.where((row == 0) & (tile_idx == 0), jnp.float32(0.0), mag2)


def _fwd_kernel(x_ref, wf_ref, xf_ref, kth_ref, *, top_k, f_pad):
    """Pass 1: fused rfft matmul + per-row kth-largest |xf|^2."""
    xb = x_ref[...].astype(jnp.bfloat16)                            # [TB, T]
    xf = jnp.dot(xb, wf_ref[...], preferred_element_type=jnp.float32)  # [TB,2Fp]
    xf_ref[...] = xf

    re = xf[:, :f_pad]
    im = xf[:, f_pad:]
    mag2 = _masked_mag2(re, im, pl.program_id(0))                   # [TB, Fp]

    # Per-row kth-largest (duplicates counted, like torch.topk): iteratively
    # take the max and knock out exactly one occurrence.  mag2 >= 0, so -1 is
    # a safe "removed" sentinel.
    col = lax.broadcasted_iota(jnp.int32, mag2.shape, 1)
    work = mag2
    kth = mag2[:, :1]
    for _ in range(top_k):
        m = jnp.max(work, axis=-1, keepdims=True)
        kth = m
        idx = jnp.min(jnp.where(work == m, col, jnp.int32(f_pad)),
                      axis=-1, keepdims=True)
        work = jnp.where(col == idx, jnp.float32(-1.0), work)

    kth_ref[...] = jnp.broadcast_to(kth, kth_ref.shape)             # lane-dense


def _inv_kernel(thr_ref, x_ref, xf_ref, wi_ref, season_ref, trend_ref, xm_ref,
                *, f_pad):
    """Pass 2: mask against the global threshold, fused irfft matmul, residual."""
    thr2 = thr_ref[0, 0]                                            # scalar f32
    xf = xf_ref[...]                                                # [TB, 2Fp]
    re = xf[:, :f_pad]
    im = xf[:, f_pad:]
    mag2 = _masked_mag2(re, im, pl.program_id(0))
    keep = mag2 > thr2                                              # xf[freq<=thr]=0

    xm_ref[:, :f_pad] = jnp.where(keep, re, 0.0).astype(jnp.bfloat16)
    xm_ref[:, f_pad:] = jnp.where(keep, im, 0.0).astype(jnp.bfloat16)

    season = jnp.dot(xm_ref[...], wi_ref[...],
                     preferred_element_type=jnp.float32)            # [TB, T]
    season_ref[...] = season
    trend_ref[...] = x_ref[...] - season


def dft_series_decomp(x: jax.Array, top_k: int = TOP_K):
    """x: [B, T] -> (x_season, x_trend), both [B, T] float32."""
    B, T = x.shape
    assert T % 2 == 0, "irfft with default n requires even T here"
    F = T // 2 + 1
    assert F >= top_k, "need at least top_k rfft bins"
    Fp = _round_up(F, _LANE)

    w_fwd, w_inv = _fused_dft_matrices(T)
    x32 = x.astype(jnp.float32)

    TB = _pick_tile_b(B)
    nb = B // TB
    cparams = pltpu.CompilerParams(dimension_semantics=("parallel",),
                                   vmem_limit_bytes=_VMEM_LIMIT)

    # ---- pass 1: forward transform + per-row kth-largest squared magnitude --
    pass1_cost = pl.CostEstimate(
        flops=2 * B * T * (2 * Fp),
        transcendentals=0,
        bytes_accessed=B * T * 4 + T * 2 * Fp * 2 + B * 2 * Fp * 4 + B * _LANE * 4)
    xf_cat, kth2 = pl.pallas_call(
        functools.partial(_fwd_kernel, top_k=top_k, f_pad=Fp),
        out_shape=(jax.ShapeDtypeStruct((B, 2 * Fp), jnp.float32),
                   jax.ShapeDtypeStruct((B, _LANE), jnp.float32)),
        grid=(nb,),
        in_specs=[pl.BlockSpec((TB, T), lambda i: (i, 0)),
                  pl.BlockSpec((T, 2 * Fp), lambda i: (0, 0))],   # resident basis
        out_specs=(pl.BlockSpec((TB, 2 * Fp), lambda i: (i, 0)),
                   pl.BlockSpec((TB, _LANE), lambda i: (i, 0))),
        compiler_params=cparams,
        cost_estimate=pass1_cost,
    )(x32, w_fwd)

    # Global threshold = min over the whole batch of each row's kth-largest
    # (squared domain; monotone, so identical keep-set to the reference).
    thr2 = jnp.min(kth2).reshape(1, 1).astype(jnp.float32)

    # ---- pass 2: mask + inverse transform + residual -------------------------
    pass2_cost = pl.CostEstimate(
        flops=2 * B * (2 * Fp) * T,
        transcendentals=0,
        bytes_accessed=4 + 3 * B * T * 4 + B * 2 * Fp * 4 + 2 * Fp * T * 2)
    season, trend = pl.pallas_call(
        functools.partial(_inv_kernel, f_pad=Fp),
        out_shape=(jax.ShapeDtypeStruct((B, T), jnp.float32),
                   jax.ShapeDtypeStruct((B, T), jnp.float32)),
        grid=(nb,),
        in_specs=[pl.BlockSpec(memory_space=pltpu.MemorySpace.SMEM),  # thr2 (1,1)
                  pl.BlockSpec((TB, T), lambda i: (i, 0)),
                  pl.BlockSpec((TB, 2 * Fp), lambda i: (i, 0)),
                  pl.BlockSpec((2 * Fp, T), lambda i: (0, 0))],   # resident basis
        out_specs=(pl.BlockSpec((TB, T), lambda i: (i, 0)),
                   pl.BlockSpec((TB, T), lambda i: (i, 0))),
        scratch_shapes=[pltpu.VMEM((TB, 2 * Fp), jnp.bfloat16)],
        compiler_params=cparams,
        cost_estimate=pass2_cost,
    )(thr2, x32, xf_cat, w_inv)

    return season, trend


def _reference(x, top_k=TOP_K):
    """Pure-JAX transliteration of the PyTorch forward (for verification)."""
    xf = jnp.fft.rfft(x, axis=-1)
    freq = jnp.abs(xf)
    freq = freq.at[0].set(0.0)           # same batched-row quirk as torch code
    top_vals, _ = lax.top_k(freq, top_k)
    thr = top_vals.min()
    xf = jnp.where(freq <= thr, 0.0 + 0.0j, xf)
    x_season = jnp.fft.irfft(xf, axis=-1)
    x_trend = x - x_season
    return x_season.astype(jnp.float32), x_trend.astype(jnp.float32)


if __name__ == "__main__":
    key = jax.random.PRNGKey(0)
    B, T = 16, 64                          # 2 batch tiles of 8; F=33 -> Fp=128
    x = jax.random.normal(key, (B, T), dtype=jnp.float32)

    season, trend = dft_series_decomp(x, top_k=TOP_K)
    jax.block_until_ready((season, trend))

    ref_season, ref_trend = _reference(x, TOP_K)
    # Decomposition is additive by construction (f32 residual in-kernel).
    assert jnp.allclose(season + trend, x, atol=1e-4), "decomposition not additive"
    # bf16 bases / operands => relaxed tolerance vs the f32 FFT reference.
    assert jnp.allclose(season, ref_season, atol=5e-2, rtol=5e-2), "season mismatch"
    assert jnp.allclose(trend, ref_trend, atol=5e-2, rtol=5e-2), "trend mismatch"

    print("KERNEL_OK")
</pallas_src>

<mosaic_0001>
module attributes {stable_mosaic.version = 11 : i64} {
  func.func @_fwd_kernel(%arg0: i32, %arg1: memref<16x64xf32, #tpu.memory_space<vmem>>, %arg2: memref<64x256xbf16, #tpu.memory_space<vmem>>, %arg3: memref<16x256xf32, #tpu.memory_space<vmem>>, %arg4: memref<16x128xf32, #tpu.memory_space<vmem>>) attributes {dimension_semantics = [#tpu.dimension_semantics<parallel>], iteration_bounds = array<i64: 1>, scalar_prefetch = 0 : i64, scratch_operands = 0 : i64, tpu.core_type = #tpu.core_type<tc>, window_params = [{transform_indices = @transform_0, window_bounds = array<i64: 16, 64>}, {pipeline_mode = #tpu.pipeline_mode<synchronous>, transform_indices = @transform_1, window_bounds = array<i64: 64, 256>}, {transform_indices = @transform_2, window_bounds = array<i64: 16, 256>}, {transform_indices = @transform_3, window_bounds = array<i64: 16, 128>}]} {
    %c0 = arith.constant 0 : index
    %c0_0 = arith.constant 0 : index
    %0 = vector.load %arg1[%c0, %c0_0] : memref<16x64xf32, #tpu.memory_space<vmem>>, vector<16x64xf32>
    %1 = arith.truncf %0 : vector<16x64xf32> to vector<16x64xbf16>
    %c0_1 = arith.constant 0 : index
    %c0_2 = arith.constant 0 : index
    %2 = vector.load %arg2[%c0_1, %c0_2] : memref<64x256xbf16, #tpu.memory_space<vmem>>, vector<64x256xbf16>
    %cst = arith.constant dense<0.000000e+00> : vector<16x256xf32>
    %3 = tpu.matmul %1, %2, %cst {dimension_numbers = #tpu.dot_dimension_numbers<[1], [0], [0], [1], [0, 0, 1, 1], [], []>} : vector<16x64xbf16>, vector<64x256xbf16>, vector<16x256xf32> -> vector<16x256xf32>
    %c0_3 = arith.constant 0 : index
    %c0_4 = arith.constant 0 : index
    %4 = vector.load %arg3[%c0_3, %c0_4] : memref<16x256xf32, #tpu.memory_space<vmem>>, vector<16x256xf32>
    tpu.vector_store %arg3[%c0_3, %c0_4], %3 {strides = array<i32>} : memref<16x256xf32, #tpu.memory_space<vmem>>, vector<16x256xf32>,
    %5 = vector.extract_strided_slice %3 {offsets = [0, 0], sizes = [16, 128], strides = [1, 1]} : vector<16x256xf32> to vector<16x128xf32>
    %6 = vector.extract_strided_slice %3 {offsets = [0, 128], sizes = [16, 128], strides = [1, 1]} : vector<16x256xf32> to vector<16x128xf32>
    %7 = arith.mulf %5, %5 : vector<16x128xf32>
    %8 = arith.mulf %6, %6 : vector<16x128xf32>
    %9 = arith.addf %7, %8 : vector<16x128xf32>
    %10 = tpu.iota {dimensions = array<i32: 0>} : vector<16x128xi32>
    %c0_i32 = arith.constant 0 : i32
    %11 = vector.broadcast %c0_i32 : i32 to vector<16x128xi32>
    %12 = arith.cmpi eq, %10, %11 : vector<16x128xi32>
    %c0_i32_5 = arith.constant 0 : i32
    %13 = arith.cmpi eq, %arg0, %c0_i32_5 : i32
    %14 = vector.broadcast %13 : i1 to vector<16x128xi1>
    %15 = arith.andi %12, %14 : vector<16x128xi1>
    %cst_6 = arith.constant 0.000000e+00 : f32
    %16 = vector.broadcast %cst_6 : f32 to vector<16x128xf32>
    %17 = arith.select %15, %16, %9 : vector<16x128xi1>, vector<16x128xf32>
    %18 = tpu.iota {dimensions = array<i32: 1>} : vector<16x128xi32>
    %cst_7 = arith.constant dense<0xFF800000> : vector<16xf32>
    %19 = vector.multi_reduction <maximumf>, %17, %cst_7 [1] : vector<16x128xf32> to vector<16xf32>
    %20 = vector.shape_cast %19 : vector<16xf32> to vector<16x1xf32>
    %21 = vector.broadcast %20 : vector<16x1xf32> to vector<16x128xf32>
    %22 = arith.cmpf oeq, %17, %21 : vector<16x128xf32>
    %c128_i32 = arith.constant 128 : i32
    %23 = vector.broadcast %c128_i32 : i32 to vector<16x128xi32>
    %24 = arith.select %22, %18, %23 : vector<16x128xi1>, vector<16x128xi32>
    %cst_8 = arith.constant dense<2147483647> : vector<16xi32>
    %25 = vector.multi_reduction <minsi>, %24, %cst_8 [1] : vector<16x128xi32> to vector<16xi32>
    %26 = vector.shape_cast %25 : vector<16xi32> to vector<16x1xi32>
    %27 = vector.broadcast %26 : vector<16x1xi32> to vector<16x128xi32>
    %28 = arith.cmpi eq, %18, %27 : vector<16x128xi32>
    %cst_9 = arith.constant -1.000000e+00 : f32
    %29 = vector.broadcast %cst_9 : f32 to vector<16x128xf32>
    %30 = arith.select %28, %29, %17 : vector<16x128xi1>, vector<16x128xf32>
    %cst_10 = arith.constant dense<0xFF800000> : vector<16xf32>
    %31 = vector.multi_reduction <maximumf>, %30, %cst_10 [1] : vector<16x128xf32> to vector<16xf32>
    %32 = vector.shape_cast %31 : vector<16xf32> to vector<16x1xf32>
    %33 = vector.broadcast %32 : vector<16x1xf32> to vector<16x128xf32>
    %34 = arith.cmpf oeq, %30, %33 : vector<16x128xf32>
    %c128_i32_11 = arith.constant 128 : i32
    %35 = vector.broadcast %c128_i32_11 : i32 to vector<16x128xi32>
    %36 = arith.select %34, %18, %35 : vector<16x128xi1>, vector<16x128xi32>
    %cst_12 = arith.constant dense<2147483647> : vector<16xi32>
    %37 = vector.multi_reduction <minsi>, %36, %cst_12 [1] : vector<16x128xi32> to vector<16xi32>
    %38 = vector.shape_cast %37 : vector<16xi32> to vector<16x1xi32>
    %39 = vector.broadcast %38 : vector<16x1xi32> to vector<16x128xi32>
    %40 = arith.cmpi eq, %18, %39 : vector<16x128xi32>
    %cst_13 = arith.constant -1.000000e+00 : f32
    %41 = vector.broadcast %cst_13 : f32 to vector<16x128xf32>
    %42 = arith.select %40, %41, %30 : vector<16x128xi1>, vector<16x128xf32>
    %cst_14 = arith.constant dense<0xFF800000> : vector<16xf32>
    %43 = vector.multi_reduction <maximumf>, %42, %cst_14 [1] : vector<16x128xf32> to vector<16xf32>
    %44 = vector.shape_cast %43 : vector<16xf32> to vector<16x1xf32>
    %45 = vector.broadcast %44 : vector<16x1xf32> to vector<16x128xf32>
    %46 = arith.cmpf oeq, %42, %45 : vector<16x128xf32>
    %c128_i32_15 = arith.constant 128 : i32
    %47 = vector.broadcast %c128_i32_15 : i32 to vector<16x128xi32>
    %48 = arith.select %46, %18, %47 : vector<16x128xi1>, vector<16x128xi32>
    %cst_16 = arith.constant dense<2147483647> : vector<16xi32>
    %49 = vector.multi_reduction <minsi>, %48, %cst_16 [1] : vector<16x128xi32> to vector<16xi32>
    %50 = vector.shape_cast %49 : vector<16xi32> to vector<16x1xi32>
    %51 = vector.broadcast %50 : vector<16x1xi32> to vector<16x128xi32>
    %52 = arith.cmpi eq, %18, %51 : vector<16x128xi32>
    %cst_17 = arith.constant -1.000000e+00 : f32
    %53 = vector.broadcast %cst_17 : f32 to vector<16x128xf32>
    %54 = arith.select %52, %53, %42 : vector<16x128xi1>, vector<16x128xf32>
    %cst_18 = arith.constant dense<0xFF800000> : vector<16xf32>
    %55 = vector.multi_reduction <maximumf>, %54, %cst_18 [1] : vector<16x128xf32> to vector<16xf32>
    %56 = vector.shape_cast %55 : vector<16xf32> to vector<16x1xf32>
    %57 = vector.broadcast %56 : vector<16x1xf32> to vector<16x128xf32>
    %58 = arith.cmpf oeq, %54, %57 : vector<16x128xf32>
    %c128_i32_19 = arith.constant 128 : i32
    %59 = vector.broadcast %c128_i32_19 : i32 to vector<16x128xi32>
    %60 = arith.select %58, %18, %59 : vector<16x128xi1>, vector<16x128xi32>
    %cst_20 = arith.constant dense<2147483647> : vector<16xi32>
    %61 = vector.multi_reduction <minsi>, %60, %cst_20 [1] : vector<16x128xi32> to vector<16xi32>
    %62 = vector.shape_cast %61 : vector<16xi32> to vector<16x1xi32>
    %63 = vector.broadcast %62 : vector<16x1xi32> to vector<16x128xi32>
    %64 = arith.cmpi eq, %18, %63 : vector<16x128xi32>
    %cst_21 = arith.constant -1.000000e+00 : f32
    %65 = vector.broadcast %cst_21 : f32 to vector<16x128xf32>
    %66 = arith.select %64, %65, %54 : vector<16x128xi1>, vector<16x128xf32>
    %cst_22 = arith.constant dense<0xFF800000> : vector<16xf32>
    %67 = vector.multi_reduction <maximumf>, %66, %cst_22 [1] : vector<16x128xf32> to vector<16xf32>
    %68 = vector.shape_cast %67 : vector<16xf32> to vector<16x1xf32>
    %69 = vector.shape_cast %68 : vector<16x1xf32> to vector<16x1xf32>
    %70 = vector.broadcast %69 : vector<16x1xf32> to vector<16x128xf32>
    %c0_23 = arith.constant 0 : index
    %c0_24 = arith.constant 0 : index
    %71 = vector.load %arg4[%c0_23, %c0_24] : memref<16x128xf32, #tpu.memory_space<vmem>>, vector<16x128xf32>
    tpu.vector_store %arg4[%c0_23, %c0_24], %70 {strides = array<i32>} : memref<16x128xf32, #tpu.memory_space<vmem>>, vector<16x128xf32>,
    return
  }
  func.func @transform_0(%arg0: i32) -> (i32, i32) {
    %c0_i32 = arith.constant 0 : i32
    %c0_i32_0 = arith.constant 0 : i32
    return %arg0, %c0_i32 : i32, i32
  }
  func.func @transform_1(%arg0: i32) -> (i32, i32) {
    %c0_i32 = arith.constant 0 : i32
    %c0_i32_0 = arith.constant 0 : i32
    %c0_i32_1 = arith.constant 0 : i32
    return %c0_i32, %c0_i32_0 : i32, i32
  }
  func.func @transform_2(%arg0: i32) -> (i32, i32) {
    %c0_i32 = arith.constant 0 : i32
    %c0_i32_0 = arith.constant 0 : i32
    return %arg0, %c0_i32 : i32, i32
  }
  func.func @transform_3(%arg0: i32) -> (i32, i32) {
    %c0_i32 = arith.constant 0 : i32
    %c0_i32_0 = arith.constant 0 : i32
    return %arg0, %c0_i32 : i32, i32
  }
}

</mosaic_0001>

<bundles_post_ra>
// kernel: tpu_custom_call.1
= control target key start
LH: loop header
LB: loop body
LE: loop exit
PB: predicated region body
PF: predicated region fallthrough
CT: control target
= control target key end

     0   :  { %9 = vsyncpa [#allocation3], 0  ;;  %s553_s0 = inlined_call_operand.hbm [shape: f32[16,64], index: 0, kind: input, shape index: {}]   ;;  %s554_s1 = inlined_call_operand.hbm [shape: bf16[64,256], index: 1, kind: input, shape index: {}]   ;;  %s555_s2 = inlined_call_operand.hbm [shape: f32[16,256], index: 2, kind: output, shape index: {0}]   ;;  %s556_s3 = inlined_call_operand.hbm [shape: f32[16,128], index: 3, kind: output, shape index: {1}]  }
   0x1   :  { %10 = vsyncpa [#allocation6], 0 }
   0x2   :  { %11 = vsyncpa [#allocation4], 0 }
   0x3   :  { %12 = vsyncpa [#allocation9], 0  ;;  %s485_s12 = smov [#allocation2]  }
   0x4   :  { %s18_s13 = sshll.u32 %s485_s12, 4  ;;  %s19_s13 = int_to_ptr.vmem [resolvable:$true] %s18_s13 }
   0x5   :  { %s405_s14 = scalar_lea.vmem %s19_s13, 256  ;;  %p410_p1 = scmp.lt.s32.totalorder %s19_s13, %s19_s13 }
   0x6   :  { %p406_p0 = scmp.ne.s32.totalorder %s19_s13, %s405_s14  ;;  %p411_p2 = scmp.lt.s32.totalorder %s405_s14, %s405_s14 }
   0x8   :  { %p412_p3 = por %p411_p2, %p410_p1 }
   0xa   :  { %p413_p4 = pnand %p412_p3, %p406_p0 }
   0xc   :  { %416 = shalt.err (!%p413_p4)
}
   0xd   :  { %s486_s15 = smov 128   ;;  %s487_s16 = smov 8  }
   0xe   :  { %24 = dma.hbm_to_vmem [thread:$0]  %s553_s0, 256, %s19_s13, [#allocation3], %s486_s15, %s486_s15, %s487_s16  }
   0xf   :  { %s488_s19 = smov [#allocation5]  }
  0x10   :  { %s30_s20 = sshll.u32 %s488_s19, 4  ;;  %s31_s20 = int_to_ptr.vmem [resolvable:$true] %s30_s20 }
  0x11   :  { %s425_s21 = scalar_lea.vmem %s31_s20, 1024  ;;  %p430_p6 = scmp.lt.s32.totalorder %s31_s20, %s31_s20 }
  0x12   :  { %p426_p5 = scmp.ne.s32.totalorder %s31_s20, %s425_s21  ;;  %p431_p7 = scmp.lt.s32.totalorder %s425_s21, %s425_s21 }
  0x14   :  { %p432_p8 = por %p431_p7, %p430_p6 }
  0x16   :  { %p433_p9 = pnand %p432_p8, %p426_p5 }
  0x18   :  { %436 = shalt.err (!%p433_p9)
}
  0x19   :  { %36 = dma.hbm_to_vmem [thread:$0]  %s554_s1, 1024, %s31_s20, [#allocation6], %s486_s15, %s486_s15, %s487_s16  }
  0x1a   :  { %477 = dma.done.wait [#allocation3], 256  }
  0x1b   :  { %478 = vsyncadd [#allocation3], 4294967040 }
  0x1c   :  { %479 = dma.done.wait [#allocation6], 1024  }
  0x1d   :  { %480 = vsyncadd [#allocation6], 4294966272  ;;  %v489_v0 = vmov 0   ;;  %v385_v1 = vld [vmem:[#allocation5 + $0x34] ss:$8 sps:$4 sm:$0xff]   ;;  %vm95_vm0 = vcmask 523264   ;;  %v152_v12 = vlaneseq }
  0x1e   :  { %131 = vmatprep.mubr.bf16.mxu0 %v489_v0  ;;  %v387_v2 = vld [vmem:[#allocation5 + $0x30] ss:$8 sps:$4 sm:$0xff]   ;;  %107 = vmatprep.subr.bf16.mxu0 %v385_v1  ;;  %v388_v3 = vld [vmem:[#allocation5 + $0x24] ss:$8 sps:$4 sm:$0xff]   ;;  %v390_v4 = vld [vmem:[#allocation5 + $0x20] ss:$8 sps:$4 sm:$0xff]  }
  0x1f   :  { %108 = vmatpush1.bf16.msra.mxu0 %v387_v2  ;;  %v391_v5 = vld [vmem:[#allocation5 + $0x14] ss:$8 sps:$4 sm:$0xff]   ;;  %v393_v6 = vld [vmem:[#allocation5 + $0x10] ss:$8 sps:$4 sm:$0xff]   ;;  %v394_v7 = vld [vmem:[#allocation5 + $0x4] ss:$8 sps:$4 sm:$0xff]  }
  0x20   :  { %109 = vmatprep.subr.bf16.mxu0 %v388_v3  ;;  %v396_v8 = vld [vmem:[#allocation5] ss:$8 sps:$4 sm:$0xff]   ;;  %v44_v9 = vld [vmem:[#allocation2] sm:$0xff]  ;;  %v45_v10 = vld [vmem:[#allocation2 + $0x8] sm:$0xff]  ;;  %v153_v14 = vshrl.u32 %v152_v12, 7  ;;  %v526_v25 = vand.u32 127, %v152_v12 }
  0x21   :  { %v46_v11 = vpack.c.bf16 %v45_v10, %v44_v9  ;;  %s490_s0 = smov [#allocation7]  }
  0x22   :  { %vm155_vm1 = vcmp.eq.s32.totalorder %v153_v14, 0  ;;  %s338_s1 = sshll.u32 %s490_s0, 4  ;;  %s339_s1 = int_to_ptr.vmem [resolvable:$true] %s338_s1 }
  0x23   :  { %110 = vmatpush1.bf16.msra.mxu0 %v390_v4  ;;  %s437_s24 = scalar_lea.vmem %s339_s1, 512  ;;  %p442_p11 = scmp.lt.s32.totalorder %s339_s1, %s339_s1 }
  0x24   :  { %111 = vmatprep.subr.bf16.mxu0 %v391_v5  ;;  %p438_p10 = scmp.ne.s32.totalorder %s339_s1, %s437_s24  ;;  %p443_p12 = scmp.lt.s32.totalorder %s437_s24, %s437_s24 }
  0x26   :  { %p444_p13 = por %p443_p12, %p442_p11 }
  0x27   :  { %112 = vmatpush1.bf16.msra.mxu0 %v393_v6 }
  0x28   :  { %113 = vmatprep.subr.bf16.mxu0 %v394_v7  ;;  %p445_p0 = pnand %p444_p13, %p438_p10 }
  0x2b   :  { %114 = vmatpush1.bf16.msra.mxu0 %v396_v8 }
  0x2e   :  { %375 = vmatmul.mubr.msk.bf16.vlgmr.msra.gmra.mxu0 %vm95_vm0, %v46_v11 }
  0xee   :  { %v133_v13 = vpop.f32.mrf.mxu0 }
  0xef   :  { %142 = vst [vmem:[#allocation7] sm:$0xff] %v133_v13  ;;  %v146_v16 = vmul.f32 %v133_v13, %v133_v13 }
  0xf0   :  { %v135_v15 = vpop.f32.mrf.mxu0 }
  0xf1   :  { %143 = vst [vmem:[#allocation7 + $0x8] sm:$0xff] %v135_v15  ;;  %v148_v17 = vmul.f32 %v135_v15, %v135_v15 }
  0xf2   :  { %v137_v18 = vpop.f32.mrf.mxu0 }
  0xf3   :  { %144 = vst [vmem:[#allocation7 + $0x10] sm:$0xff] %v137_v18  ;;  %v150_v19 = vadd.f32 %v148_v17, %v146_v16  ;;  %v147_v21 = vmul.f32 %v137_v18, %v137_v18 }
  0xf4   :  { %v139_v20 = vpop.f32.mrf.mxu0 }
  0xf5   :  { %145 = vst [vmem:[#allocation7 + $0x18] sm:$0xff] %v139_v20  ;;  %v149_v22 = vmul.f32 %v139_v20, %v139_v20  ;;  %v163_v23 = vsel %vm155_vm1, 0.0, %v150_v19 }
  0xf6   :  { %167 = vmax.xlane.f32.xlu0 %v163_v23 }
  0xf7   :  { %v151_v24 = vadd.f32 %v149_v22, %v147_v21 }
  0xfa   :  { %169 = vmax.xlane.f32.xlu0 %v151_v24 }
 0x17f   :  { %v168_v26 = vpop.xlane.xlu0 %167 }
 0x180   :  { %vm171_vm2 = vcmp.eq.f32.partialorder %v163_v23, %v168_v26 }
 0x181   :  { %v173_v27 = vsel %vm171_vm2, %v526_v25, 128 }
 0x182   :  { %v176_v28 = vshra.s32 %v173_v27, 16  ;;  %v175_v34 = vand.u32 65535, %v173_v27 }
 0x183   :  { %v170_v29 = vpop.xlane.xlu0 %169 }
 0x184   :  { %vm172_vm3 = vcmp.eq.f32.partialorder %v151_v24, %v170_v29  ;;  %v178_v30 = vcvt.s32.f32 %v176_v28  ;;  %v177_v37 = vcvt.s32.f32 %v175_v34 }
 0x185   :  { %v174_v31 = vsel %vm172_vm3, %v526_v25, 128 }
 0x186   :  { %179 = vmin.xlane.f32.xlu1 %v178_v30  ;;  %v190_v32 = vshra.s32 %v174_v31, 16  ;;  %v189_v35 = vand.u32 65535, %v174_v31 }
 0x188   :  { %v192_v33 = vcvt.s32.f32 %v190_v32  ;;  %v191_v40 = vcvt.s32.f32 %v189_v35 }
 0x18a   :  { %193 = vmin.xlane.f32.xlu1 %v192_v33 }
 0x20f   :  { %v180_v36 = vpop.xlane.xlu1 %179 }
 0x210   :  { %vm181_vm4 = vcmp.eq.f32.partialorder %v178_v30, %v180_v36  ;;  %v186_v42 = vcvt.f32.s32 %v180_v36 }
 0x211   :  { %v182_v38 = vsel %vm181_vm4, %v177_v37, inf }
 0x212   :  { %183 = vmin.xlane.f32.xlu0 %v182_v38  ;;  %v187_v44 = vshll.u32 %v186_v42, 16 }
 0x213   :  { %v194_v39 = vpop.xlane.xlu1 %193 }
 0x214   :  { %vm195_vm5 = vcmp.eq.f32.partialorder %v192_v33, %v194_v39  ;;  %v200_v45 = vcvt.f32.s32 %v194_v39 }
 0x215   :  { %v196_v41 = vsel %vm195_vm5, %v191_v40, inf }
 0x216   :  { %197 = vmin.xlane.f32.xlu1 %v196_v41  ;;  %v201_v49 = vshll.u32 %v200_v45, 16 }
 0x29b   :  { %v184_v43 = vpop.xlane.xlu0 %183 }
 0x29c   :  { %v185_v46 = vcvt.f32.s32 %v184_v43 }
 0x29e   :  { %v188_v47 = vadd.s32 %v187_v44, %v185_v46 }
 0x29f   :  { %v198_v48 = vpop.xlane.xlu1 %197 }
 0x2a0   :  { %v199_v50 = vcvt.f32.s32 %v198_v48  ;;  %vm203_vm6 = vcmp.eq.s32.totalorder %v526_v25, %v188_v47 }
 0x2a1   :  { %v205_v51 = vsel %vm203_vm6, -1.0, %v163_v23 }
 0x2a2   :  { %v202_v52 = vadd.s32 %v201_v49, %v199_v50  ;;  %207 = vmax.xlane.f32.xlu0 %v205_v51 }
 0x2a4   :  { %vm204_vm7 = vcmp.eq.s32.totalorder %v526_v25, %v202_v52 }
 0x2a5   :  { %v206_v53 = vsel %vm204_vm7, -1.0, %v151_v24 }
 0x2a6   :  { %209 = vmax.xlane.f32.xlu1 %v206_v53 }
 0x32b   :  { %v208_v54 = vpop.xlane.xlu0 %207 }
 0x32c   :  { %vm211_vm8 = vcmp.eq.f32.partialorder %v205_v51, %v208_v54 }
 0x32d   :  { %v213_v55 = vsel %vm211_vm8, %v526_v25, 128 }
 0x32e   :  { %v216_v56 = vshra.s32 %v213_v55, 16  ;;  %v215_v62 = vand.u32 65535, %v213_v55 }
 0x32f   :  { %v210_v57 = vpop.xlane.xlu1 %209 }
 0x330   :  { %vm212_vm9 = vcmp.eq.f32.partialorder %v206_v53, %v210_v57  ;;  %v218_v58 = vcvt.s32.f32 %v216_v56  ;;  %v217_v1 = vcvt.s32.f32 %v215_v62 }
 0x331   :  { %v214_v59 = vsel %vm212_vm9, %v526_v25, 128 }
 0x332   :  { %219 = vmin.xlane.f32.xlu0 %v218_v58  ;;  %v230_v60 = vshra.s32 %v214_v59, 16  ;;  %v229_v63 = vand.u32 65535, %v214_v59 }
 0x334   :  { %v232_v61 = vcvt.s32.f32 %v230_v60  ;;  %v231_v4 = vcvt.s32.f32 %v229_v63 }
 0x336   :  { %233 = vmin.xlane.f32.xlu1 %v232_v61 }
 0x3bb   :  { %v220_v0 = vpop.xlane.xlu0 %219 }
 0x3bc   :  { %vm221_vm10 = vcmp.eq.f32.partialorder %v218_v58, %v220_v0  ;;  %v226_v6 = vcvt.f32.s32 %v220_v0 }
 0x3bd   :  { %v222_v2 = vsel %vm221_vm10, %v217_v1, inf }
 0x3be   :  { %223 = vmin.xlane.f32.xlu0 %v222_v2  ;;  %v227_v8 = vshll.u32 %v226_v6, 16 }
 0x3bf   :  { %v234_v3 = vpop.xlane.xlu1 %233 }
 0x3c0   :  { %vm235_vm11 = vcmp.eq.f32.partialorder %v232_v61, %v234_v3  ;;  %v240_v9 = vcvt.f32.s32 %v234_v3 }
 0x3c1   :  { %v236_v5 = vsel %vm235_vm11, %v231_v4, inf }
 0x3c2   :  { %237 = vmin.xlane.f32.xlu1 %v236_v5  ;;  %v241_v13 = vshll.u32 %v240_v9, 16 }
 0x447   :  { %v224_v7 = vpop.xlane.xlu0 %223 }
 0x448   :  { %v225_v10 = vcvt.f32.s32 %v224_v7 }
 0x44a   :  { %v228_v11 = vadd.s32 %v227_v8, %v225_v10 }
 0x44b   :  { %v238_v12 = vpop.xlane.xlu1 %237 }
 0x44c   :  { %v239_v14 = vcvt.f32.s32 %v238_v12  ;;  %vm243_vm12 = vcmp.eq.s32.totalorder %v526_v25, %v228_v11 }
 0x44d   :  { %v245_v15 = vsel %vm243_vm12, -1.0, %v205_v51 }
 0x44e   :  { %v242_v16 = vadd.s32 %v241_v13, %v239_v14  ;;  %247 = vmax.xlane.f32.xlu0 %v245_v15 }
 0x450   :  { %vm244_vm13 = vcmp.eq.s32.totalorder %v526_v25, %v242_v16 }
 0x451   :  { %v246_v17 = vsel %vm244_vm13, -1.0, %v206_v53 }
 0x452   :  { %249 = vmax.xlane.f32.xlu1 %v246_v17 }
 0x4d7   :  { %v248_v18 = vpop.xlane.xlu0 %247 }
 0x4d8   :  { %vm251_vm14 = vcmp.eq.f32.partialorder %v245_v15, %v248_v18 }
 0x4d9   :  { %v253_v19 = vsel %vm251_vm14, %v526_v25, 128 }
 0x4da   :  { %v256_v20 = vshra.s32 %v253_v19, 16  ;;  %v255_v27 = vand.u32 65535, %v253_v19 }
 0x4db   :  { %v250_v21 = vpop.xlane.xlu1 %249 }
 0x4dc   :  { %vm252_vm15 = vcmp.eq.f32.partialorder %v246_v17, %v250_v21  ;;  %v258_v22 = vcvt.s32.f32 %v256_v20  ;;  %v257_v30 = vcvt.s32.f32 %v255_v27 }
 0x4dd   :  { %v254_v23 = vsel %vm252_vm15, %v526_v25, 128 }
 0x4de   :  { %259 = vmin.xlane.f32.xlu0 %v258_v22  ;;  %v270_v24 = vshra.s32 %v254_v23, 16  ;;  %v269_v28 = vand.u32 65535, %v254_v23 }
 0x4e0   :  { %v272_v26 = vcvt.s32.f32 %v270_v24  ;;  %v271_v33 = vcvt.s32.f32 %v269_v28 }
 0x4e2   :  { %273 = vmin.xlane.f32.xlu1 %v272_v26 }
 0x567   :  { %v260_v29 = vpop.xlane.xlu0 %259 }
 0x568   :  { %vm261_vm0 = vcmp.eq.f32.partialorder %v258_v22, %v260_v29  ;;  %v266_v35 = vcvt.f32.s32 %v260_v29 }
 0x569   :  { %v262_v31 = vsel %vm261_vm0, %v257_v30, inf }
 0x56a   :  { %263 = vmin.xlane.f32.xlu0 %v262_v31  ;;  %v267_v37 = vshll.u32 %v266_v35, 16 }
 0x56b   :  { %v274_v32 = vpop.xlane.xlu1 %273 }
 0x56c   :  { %vm275_vm1 = vcmp.eq.f32.partialorder %v272_v26, %v274_v32  ;;  %v280_v38 = vcvt.f32.s32 %v274_v32 }
 0x56d   :  { %v276_v34 = vsel %vm275_vm1, %v271_v33, inf }
 0x56e   :  { %277 = vmin.xlane.f32.xlu1 %v276_v34  ;;  %v281_v42 = vshll.u32 %v280_v38, 16 }
 0x5f3   :  { %v264_v36 = vpop.xlane.xlu0 %263 }
 0x5f4   :  { %v265_v39 = vcvt.f32.s32 %v264_v36 }
 0x5f6   :  { %v268_v40 = vadd.s32 %v267_v37, %v265_v39 }
 0x5f7   :  { %v278_v41 = vpop.xlane.xlu1 %277 }
 0x5f8   :  { %v279_v43 = vcvt.f32.s32 %v278_v41  ;;  %vm283_vm2 = vcmp.eq.s32.totalorder %v526_v25, %v268_v40 }
 0x5f9   :  { %v285_v44 = vsel %vm283_vm2, -1.0, %v245_v15 }
 0x5fa   :  { %v282_v45 = vadd.s32 %v281_v42, %v279_v43  ;;  %287 = vmax.xlane.f32.xlu0 %v285_v44 }
 0x5fc   :  { %vm284_vm3 = vcmp.eq.s32.totalorder %v526_v25, %v282_v45 }
 0x5fd   :  { %v286_v46 = vsel %vm284_vm3, -1.0, %v246_v17 }
 0x5fe   :  { %289 = vmax.xlane.f32.xlu1 %v286_v46 }
 0x683   :  { %v288_v47 = vpop.xlane.xlu0 %287 }
 0x684   :  { %vm291_vm4 = vcmp.eq.f32.partialorder %v285_v44, %v288_v47 }
 0x685   :  { %v293_v48 = vsel %vm291_vm4, %v526_v25, 128 }
 0x686   :  { %v296_v49 = vshra.s32 %v293_v48, 16  ;;  %v295_v55 = vand.u32 65535, %v293_v48 }
 0x687   :  { %v290_v50 = vpop.xlane.xlu1 %289 }
 0x688   :  { %vm292_vm5 = vcmp.eq.f32.partialorder %v286_v46, %v290_v50  ;;  %v298_v51 = vcvt.s32.f32 %v296_v49  ;;  %v297_v58 = vcvt.s32.f32 %v295_v55 }
 0x689   :  { %v294_v52 = vsel %vm292_vm5, %v526_v25, 128 }
 0x68a   :  { %299 = vmin.xlane.f32.xlu0 %v298_v51  ;;  %v310_v53 = vshra.s32 %v294_v52, 16  ;;  %v309_v56 = vand.u32 65535, %v294_v52 }
 0x68c   :  { %v312_v54 = vcvt.s32.f32 %v310_v53  ;;  %v311_v61 = vcvt.s32.f32 %v309_v56 }
 0x68e   :  { %313 = vmin.xlane.f32.xlu1 %v312_v54 }
 0x713   :  { %v300_v57 = vpop.xlane.xlu0 %299 }
 0x714   :  { %vm301_vm6 = vcmp.eq.f32.partialorder %v298_v51, %v300_v57  ;;  %v306_v63 = vcvt.f32.s32 %v300_v57 }
 0x715   :  { %v302_v59 = vsel %vm301_vm6, %v297_v58, inf }
 0x716   :  { %303 = vmin.xlane.f32.xlu0 %v302_v59  ;;  %v307_v1 = vshll.u32 %v306_v63, 16 }
 0x717   :  { %v314_v60 = vpop.xlane.xlu1 %313 }
 0x718   :  { %vm315_vm7 = vcmp.eq.f32.partialorder %v312_v54, %v314_v60  ;;  %v320_v2 = vcvt.f32.s32 %v314_v60 }
 0x719   :  { %v316_v62 = vsel %vm315_vm7, %v311_v61, inf }
 0x71a   :  { %317 = vmin.xlane.f32.xlu1 %v316_v62  ;;  %v321_v6 = vshll.u32 %v320_v2, 16 }
 0x79f   :  { %v304_v0 = vpop.xlane.xlu0 %303 }
 0x7a0   :  { %v305_v3 = vcvt.f32.s32 %v304_v0 }
 0x7a2   :  { %v308_v4 = vadd.s32 %v307_v1, %v305_v3 }
 0x7a3   :  { %v318_v5 = vpop.xlane.xlu1 %317 }
 0x7a4   :  { %v319_v7 = vcvt.f32.s32 %v318_v5  ;;  %vm323_vm8 = vcmp.eq.s32.totalorder %v526_v25, %v308_v4 }
 0x7a5   :  { %v325_v8 = vsel %vm323_vm8, -1.0, %v285_v44 }
 0x7a6   :  { %v322_v9 = vadd.s32 %v321_v6, %v319_v7  ;;  %327 = vmax.xlane.f32.xlu0 %v325_v8 }
 0x7a8   :  { %vm324_vm9 = vcmp.eq.s32.totalorder %v526_v25, %v322_v9 }
 0x7a9   :  { %v326_v10 = vsel %vm324_vm9, -1.0, %v286_v46 }
 0x7aa   :  { %329 = vmax.xlane.f32.xlu1 %v326_v10 }
 0x7ab   :  { %448 = shalt.err (!%p445_p0)
}
 0x7ac   :  { %s491_s25 = smov 256   ;;  %s492_s26 = smov 16  }
 0x7ad   :  { %344 = dma.vmem_to_hbm [thread:$0]  %s339_s1, 512, %s555_s2, [#allocation4], %s491_s25, %s491_s25, %s492_s26  }
 0x7ae   :  { %s493_s29 = smov [#allocation8]  }
 0x7af   :  { %s350_s30 = sshll.u32 %s493_s29, 4  ;;  %s351_s30 = int_to_ptr.vmem [resolvable:$true] %s350_s30 }
 0x7b0   :  { %s457_s4 = scalar_lea.vmem %s351_s30, 256  ;;  %p462_p2 = scmp.lt.s32.totalorder %s351_s30, %s351_s30 }
 0x7b1   :  { %p458_p1 = scmp.ne.s32.totalorder %s351_s30, %s457_s4  ;;  %p463_p3 = scmp.lt.s32.totalorder %s457_s4, %s457_s4 }
 0x7b3   :  { %p464_p4 = por %p463_p3, %p462_p2 }
 0x7b5   :  { %p465_p5 = pnand %p464_p4, %p458_p1 }
 0x82f   :  { %v328_v11 = vpop.xlane.xlu0 %327 }
 0x830   :  { %331 = vst [vmem:[#allocation8] sm:$0xff] %v328_v11 }
 0x833   :  { %v330_v25 = vpop.xlane.xlu1 %329 }
 0x834   :  { %332 = vst [vmem:[#allocation8 + $0x8] sm:$0xff] %v330_v25 }
 0x835   :  { %468 = shalt.err (!%p465_p5)
}
 0x836   :  { %356 = dma.vmem_to_hbm [thread:$0]  %s351_s30, 256, %s556_s3, [#allocation9], %s486_s15, %s486_s15, %s487_s16  }
 0x837   :  { %481 = dma.done.wait [#allocation4], 512  }
 0x838   :  { %482 = vsyncadd [#allocation4], 4294966784 }
 0x839   :  { %483 = dma.done.wait [#allocation9], 256  }
 0x83a   :  { %484 = vsyncadd [#allocation9], 4294967040 }
 0x83b   :  { %363 = vsyncpa [#allocation3], 1 }
 0x83c   :  { %364 = vsyncpa [#allocation6], 1 }
 0x83d   :  { %365 = vsyncpa [#allocation4], 1 }
 0x83e   :  { %366 = vsyncpa [#allocation9], 1 }

</bundles_post_ra>
